<compile_context>
chip_gen: v7x
topology: tpu7x:2x2x1
jax: 0.10.0
libtpu: 0.0.40
codegen_flags: <defaults>
</compile_context>

<pallas_src>
import numpy as np
import jax
import jax.numpy as jnp
from jax.experimental import pallas as pl
from jax.experimental.pallas import tpu as pltpu

OFFSETS = [0, 99, 198, 270, 336]
DIMS = [[9, 11], [9, 11], [9, 8], [6, 11]]
NBLOCKS = 9
BLOCK = 336
TOTAL = NBLOCKS * BLOCK                     # 3024
NGROUPS = sum(d0 for d0, _ in DIMS)         # 33 softmax groups per 336 block
GP = 128                                    # groups padded to one lane tile
MAX_TR = 1024                               # max rows (width 336) per grid step
TARGET_STEPS = 8                            # aim for >= ~8 grid steps (megacore)
ROW_ALIGN = 16                              # sublane tile for f32 (8) and bf16/f16 (16)


def _cdiv(a, b):
    return -(-a // b)


def _round_up(a, b):
    return _cdiv(a, b) * b


def _build_group_matrices():
    """One-hot (336, GP) group-membership matrix M and its transpose (bf16-exact)."""
    col_group = np.zeros((BLOCK,), dtype=np.int64)
    g = 0
    for j in range(4):
        d0, d1 = DIMS[j]
        for r in range(d0):
            s = OFFSETS[j] + r * d1
            col_group[s:s + d1] = g
            g += 1
    assert g == NGROUPS
    m = np.zeros((BLOCK, GP), dtype=np.float32)
    m[np.arange(BLOCK), col_group] = 1.0
    # {0,1} entries are exactly representable in bf16 -> bf16 RHS costs nothing.
    return (jnp.asarray(m, dtype=jnp.bfloat16),
            jnp.asarray(np.ascontiguousarray(m.T), dtype=jnp.bfloat16))


_M, _MT = _build_group_matrices()


def _split3(a):
    """Exact 3-term bf16 split of an f32 array: a == hi + mid + lo (to ~2^-24)."""
    hi = a.astype(jnp.bfloat16)
    r1 = a - hi.astype(jnp.float32)
    mid = r1.astype(jnp.bfloat16)
    lo = (r1 - mid.astype(jnp.float32)).astype(jnp.bfloat16)
    return hi, mid, lo


def _exact_dot(a_f32, b_bf16):
    """f32-exact (TR,K)@(K,N) against an exactly-bf16 RHS: 3 DEFAULT MXU passes."""
    hi, mid, lo = _split3(a_f32)
    dot = lambda t: jnp.dot(t, b_bf16, preferred_element_type=jnp.float32)
    return dot(hi) + dot(mid) + dot(lo)


def _softmax_kernel(x_ref, m_ref, mt_ref, o_ref):
    # x_ref/o_ref: (TR, 336) native dtype; m_ref: (336, GP) bf16; mt_ref: (GP, 336) bf16.
    x = x_ref[...].astype(jnp.float32)      # in-kernel upcast: 16-bit inputs stream native
    # Per-336-block max: constant within every softmax group (value unchanged),
    # lane-dense, no per-group gather.
    bmax = jnp.max(x, axis=-1, keepdims=True)              # (TR, 1)   XLU
    e = jnp.exp(x - bmax)                                  # (TR, 336) EUP, values in (0, 1]
    # Per-group sums via the one-hot MXU matmul (exact: bf16 RHS + 3-term LHS split).
    gs = _exact_dot(e, m_ref[...])                         # (TR, GP)
    # Guard the padded (all-zero) group columns and pathological underflow so
    # the broadcast-back matmul never sees inf * 0.
    gs = jnp.maximum(gs, 1e-30)
    inv = pl.reciprocal(gs, approx=False)                  # exact 1/sum
    # Broadcast 1/sum back to every column of its group (exact one-hot gather).
    inv_col = _exact_dot(inv, mt_ref[...])                 # (TR, 336)
    o_ref[...] = (e * inv_col).astype(o_ref.dtype)


@jax.jit
def my_softmax(x):
    """x: (B, 3024) float -> (B, 3024) same dtype, matches mySoftmax.forward."""
    assert x.shape[-1] == TOTAL, f"expected {TOTAL} features, got {x.shape[-1]}"
    if x.dtype not in (jnp.float32, jnp.bfloat16, jnp.float16):
        x = x.astype(jnp.float32)
    b = x.shape[0]
    r = b * NBLOCKS                          # rows of width 336
    xr = x.reshape(r, BLOCK)                 # free: row-major contiguous view

    # Row tile: big enough to amortize the ~0.35us/step overhead, capped so the
    # working set fits v7x's 64 MiB/TC VMEM, and small enough that the
    # "parallel" axis has ~TARGET_STEPS steps for megacore sharding.  The
    # ragged tail is handled by grid masking, not by padding the array.
    tr = min(MAX_TR, max(ROW_ALIGN, _round_up(_cdiv(r, TARGET_STEPS), ROW_ALIGN)))
    grid = (_cdiv(r, tr),)

    out = pl.pallas_call(
        _softmax_kernel,
        out_shape=jax.ShapeDtypeStruct((r, BLOCK), x.dtype),
        grid=grid,
        in_specs=[
            pl.BlockSpec((tr, BLOCK), lambda i: (i, 0)),
            pl.BlockSpec((BLOCK, GP), lambda i: (0, 0)),   # constant, fetched once
            pl.BlockSpec((GP, BLOCK), lambda i: (0, 0)),   # constant, fetched once
        ],
        out_specs=pl.BlockSpec((tr, BLOCK), lambda i: (i, 0)),
        compiler_params=pltpu.CompilerParams(
            dimension_semantics=("parallel",),   # shard steps across TCs on v7x
            vmem_limit_bytes=32 * 1024 * 1024),  # fits v7x 64 MiB/TC with headroom
    )(xr, _M, _MT)

    return out.reshape(b, TOTAL)


def _reference(x):
    """Pure-JAX transcription of the PyTorch forward (for verification)."""
    outs = []
    for i in range(NBLOCKS):
        for j in range(4):
            a = x[:, i * BLOCK + OFFSETS[j]: i * BLOCK + OFFSETS[j + 1]]
            a = a.reshape(x.shape[0], DIMS[j][0], DIMS[j][1])
            a = jax.nn.softmax(a, axis=2)
            outs.append(a.reshape(x.shape[0], DIMS[j][0] * DIMS[j][1]))
    return jnp.concatenate(outs, axis=1)


if __name__ == "__main__":
    key = jax.random.PRNGKey(0)
    B = 2
    x = jax.random.normal(key, (B, TOTAL), dtype=jnp.float32)

    y = jax.block_until_ready(my_softmax(x))
    y_ref = jax.block_until_ready(_reference(x))
    np.testing.assert_allclose(np.asarray(y), np.asarray(y_ref),
                               rtol=1e-5, atol=1e-6)
    print("KERNEL_OK")
</pallas_src>

<mosaic_0001>
module attributes {stable_mosaic.version = 11 : i64} {
  func.func @_softmax_kernel(%arg0: i32, %arg1: memref<16x336xf32, #tpu.memory_space<vmem>>, %arg2: memref<336x128xbf16, #tpu.memory_space<vmem>>, %arg3: memref<128x336xbf16, #tpu.memory_space<vmem>>, %arg4: memref<16x336xf32, #tpu.memory_space<vmem>>) attributes {dimension_semantics = [#tpu.dimension_semantics<parallel>], iteration_bounds = array<i64: 2>, scalar_prefetch = 0 : i64, scratch_operands = 0 : i64, tpu.core_type = #tpu.core_type<tc>, window_params = [{transform_indices = @transform_0, window_bounds = array<i64: 16, 336>}, {pipeline_mode = #tpu.pipeline_mode<synchronous>, transform_indices = @transform_1, window_bounds = array<i64: 336, 128>}, {pipeline_mode = #tpu.pipeline_mode<synchronous>, transform_indices = @transform_2, window_bounds = array<i64: 128, 336>}, {transform_indices = @transform_3, window_bounds = array<i64: 16, 336>}]} {
    %c0 = arith.constant 0 : index
    %c0_0 = arith.constant 0 : index
    %0 = vector.load %arg1[%c0, %c0_0] : memref<16x336xf32, #tpu.memory_space<vmem>>, vector<16x336xf32>
    %cst = arith.constant dense<0xFF800000> : vector<16xf32>
    %1 = vector.multi_reduction <maximumf>, %0, %cst [1] : vector<16x336xf32> to vector<16xf32>
    %2 = vector.shape_cast %1 : vector<16xf32> to vector<16x1xf32>
    %3 = vector.broadcast %2 : vector<16x1xf32> to vector<16x336xf32>
    %4 = arith.subf %0, %3 : vector<16x336xf32>
    %5 = math.exp %4 : vector<16x336xf32>
    %c0_1 = arith.constant 0 : index
    %c0_2 = arith.constant 0 : index
    %6 = vector.load %arg2[%c0_1, %c0_2] : memref<336x128xbf16, #tpu.memory_space<vmem>>, vector<336x128xbf16>
    %7 = arith.truncf %5 : vector<16x336xf32> to vector<16x336xbf16>
    %8 = arith.extf %7 : vector<16x336xbf16> to vector<16x336xf32>
    %9 = arith.subf %5, %8 : vector<16x336xf32>
    %10 = arith.truncf %9 : vector<16x336xf32> to vector<16x336xbf16>
    %11 = arith.extf %10 : vector<16x336xbf16> to vector<16x336xf32>
    %12 = arith.subf %9, %11 : vector<16x336xf32>
    %13 = arith.truncf %12 : vector<16x336xf32> to vector<16x336xbf16>
    %cst_3 = arith.constant dense<0.000000e+00> : vector<16x128xf32>
    %14 = tpu.matmul %7, %6, %cst_3 {dimension_numbers = #tpu.dot_dimension_numbers<[1], [0], [0], [1], [0, 0, 1, 1], [], []>} : vector<16x336xbf16>, vector<336x128xbf16>, vector<16x128xf32> -> vector<16x128xf32>
    %cst_4 = arith.constant dense<0.000000e+00> : vector<16x128xf32>
    %15 = tpu.matmul %10, %6, %cst_4 {dimension_numbers = #tpu.dot_dimension_numbers<[1], [0], [0], [1], [0, 0, 1, 1], [], []>} : vector<16x336xbf16>, vector<336x128xbf16>, vector<16x128xf32> -> vector<16x128xf32>
    %16 = arith.addf %14, %15 : vector<16x128xf32>
    %cst_5 = arith.constant dense<0.000000e+00> : vector<16x128xf32>
    %17 = tpu.matmul %13, %6, %cst_5 {dimension_numbers = #tpu.dot_dimension_numbers<[1], [0], [0], [1], [0, 0, 1, 1], [], []>} : vector<16x336xbf16>, vector<336x128xbf16>, vector<16x128xf32> -> vector<16x128xf32>
    %18 = arith.addf %16, %17 : vector<16x128xf32>
    %cst_6 = arith.constant 1.000000e-30 : f32
    %19 = vector.broadcast %cst_6 : f32 to vector<16x128xf32>
    %20 = arith.maximumf %18, %19 : vector<16x128xf32>
    %21 = tpu.reciprocal %20 : vector<16x128xf32> -> vector<16x128xf32>
    %c0_7 = arith.constant 0 : index
    %c0_8 = arith.constant 0 : index
    %22 = vector.load %arg3[%c0_7, %c0_8] : memref<128x336xbf16, #tpu.memory_space<vmem>>, vector<128x336xbf16>
    %23 = arith.truncf %21 : vector<16x128xf32> to vector<16x128xbf16>
    %24 = arith.extf %23 : vector<16x128xbf16> to vector<16x128xf32>
    %25 = arith.subf %21, %24 : vector<16x128xf32>
    %26 = arith.truncf %25 : vector<16x128xf32> to vector<16x128xbf16>
    %27 = arith.extf %26 : vector<16x128xbf16> to vector<16x128xf32>
    %28 = arith.subf %25, %27 : vector<16x128xf32>
    %29 = arith.truncf %28 : vector<16x128xf32> to vector<16x128xbf16>
    %cst_9 = arith.constant dense<0.000000e+00> : vector<16x336xf32>
    %30 = tpu.matmul %23, %22, %cst_9 {dimension_numbers = #tpu.dot_dimension_numbers<[1], [0], [0], [1], [0, 0, 1, 1], [], []>} : vector<16x128xbf16>, vector<128x336xbf16>, vector<16x336xf32> -> vector<16x336xf32>
    %cst_10 = arith.constant dense<0.000000e+00> : vector<16x336xf32>
    %31 = tpu.matmul %26, %22, %cst_10 {dimension_numbers = #tpu.dot_dimension_numbers<[1], [0], [0], [1], [0, 0, 1, 1], [], []>} : vector<16x128xbf16>, vector<128x336xbf16>, vector<16x336xf32> -> vector<16x336xf32>
    %32 = arith.addf %30, %31 : vector<16x336xf32>
    %cst_11 = arith.constant dense<0.000000e+00> : vector<16x336xf32>
    %33 = tpu.matmul %29, %22, %cst_11 {dimension_numbers = #tpu.dot_dimension_numbers<[1], [0], [0], [1], [0, 0, 1, 1], [], []>} : vector<16x128xbf16>, vector<128x336xbf16>, vector<16x336xf32> -> vector<16x336xf32>
    %34 = arith.addf %32, %33 : vector<16x336xf32>
    %35 = arith.mulf %5, %34 : vector<16x336xf32>
    %c0_12 = arith.constant 0 : index
    %c0_13 = arith.constant 0 : index
    %36 = vector.load %arg4[%c0_12, %c0_13] : memref<16x336xf32, #tpu.memory_space<vmem>>, vector<16x336xf32>
    tpu.vector_store %arg4[%c0_12, %c0_13], %35 {strides = array<i32>} : memref<16x336xf32, #tpu.memory_space<vmem>>, vector<16x336xf32>,
    return
  }
  func.func @transform_0(%arg0: i32) -> (i32, i32) {
    %c0_i32 = arith.constant 0 : i32
    %c0_i32_0 = arith.constant 0 : i32
    return %arg0, %c0_i32 : i32, i32
  }
  func.func @transform_1(%arg0: i32) -> (i32, i32) {
    %c0_i32 = arith.constant 0 : i32
    %c0_i32_0 = arith.constant 0 : i32
    %c0_i32_1 = arith.constant 0 : i32
    return %c0_i32, %c0_i32_0 : i32, i32
  }
  func.func @transform_2(%arg0: i32) -> (i32, i32) {
    %c0_i32 = arith.constant 0 : i32
    %c0_i32_0 = arith.constant 0 : i32
    %c0_i32_1 = arith.constant 0 : i32
    return %c0_i32, %c0_i32_0 : i32, i32
  }
  func.func @transform_3(%arg0: i32) -> (i32, i32) {
    %c0_i32 = arith.constant 0 : i32
    %c0_i32_0 = arith.constant 0 : i32
    return %arg0, %c0_i32 : i32, i32
  }
}

</mosaic_0001>

<bundles_post_ra>
// kernel: my_softmax.1
= control target key start
LH: loop header
LB: loop body
LE: loop exit
PB: predicated region body
PF: predicated region fallthrough
CT: control target
= control target key end

     0   :  { %s1893_s12 = smov 0   ;;  %s1895_s13 = smov 0   ;;  %s2464_s0 = inlined_call_operand.vmem [shape: f32[18,336], index: 0, kind: input, shape index: {}]   ;;  %s2465_s1 = inlined_call_operand.vmem [shape: bf16[336,128], index: 1, kind: input, shape index: {}]   ;;  %s2466_s2 = inlined_call_operand.vmem [shape: bf16[128,336], index: 2, kind: input, shape index: {}]   ;;  %s2467_s3 = inlined_call_operand.vmem [shape: f32[18,336], index: 3, kind: output, shape index: {}]  }
   0x1   :  { %s1897_s14 = smov 0  }
   0x2 LB: > { %s1906_s15 = sadd.s32 4294967295, %s1836_s14   ;;  %s1908_s16 = sadd.s32 1, %s1836_s14   ;;  %s1836_s14 = sphi %s1897_s14, %s2475_s14   ;;  %s1832_s13 = sphi %s1895_s13, %s2474_s13   ;;  %s1828_s12 = sphi %s1893_s12, %s2473_s12  }
   0x3   : > { %s85_s17 = ssub.s32 %s1836_s14, %s1908_s16  ;;  %s88_s18 = sadd.s32 1, %s1832_s13 }
   0x4   : > { %p86_p0 = scmp.eq.s32.totalorder %s85_s17, 0  ;;  %p98_p1 = scmp.ne.s32.totalorder %s1832_s13, %s1828_s12 }
   0x5   : > { %p99_p2 = scmp.eq.s32.totalorder %s1906_s15, 1  ;;  %p1313_p3 = scmp.ge.s32.totalorder %s1836_s14, 1 }
   0x6   : > { %s1916_s19 = scalar_select %p86_p0, %s1832_s13, %s88_s18  }
   0x7   : > { %p1918_p4 = por %p99_p2, %p98_p1  ;;  %p149_p5 = scmp.lt.s32.totalorder %s1836_s14, 3 }
   0x9   : > { %p150_p6 = pnand %p1313_p3, %p149_p5 }
   0xa   : > { %s1923_s21 = sshll.u32 (!%p150_p6), %s1906_s15, 1  ;;  %v1929_v0 = vld [vmem:[%s2465_s1 + $0x40] sm:$0xff] (!%p150_p6)   ;;  %v1941_v2 = vld [vmem:[%s2465_s1 + $0x48] sm:$0xff] (!%p150_p6)   ;;  %v1955_v4 = vld [vmem:[%s2465_s1 + $0x50] sm:$0xff] (!%p150_p6)   ;;  %vm208_vm0 = vcmask (!%p150_p6), 654336   ;;  %v1870_v28 = vmov (!%p150_p6), 0.0  }
   0xb   : > { %153 = sbr.rel (%p150_p6) target bundleno = 825 (0x339), region = 32  ;;  %p184_p7 = scmp.lt.s32.totalorder (!%p150_p6), %s1923_s21, 2  ;;  %v1934_v1 = vld [vmem:[%s2465_s1] sm:$0xff] (!%p150_p6)   ;;  %1406 = vmatprep.subr.bf16.mxu1 (!%p150_p6), %v1929_v0  ;;  %1378 = vmatprep.subr.bf16.mxu0 (!%p150_p6), %v1929_v0  ;;  %v1948_v3 = vld [vmem:[%s2465_s1 + $0x8] sm:$0xff] (!%p150_p6)   ;;  %v1961_v5 = vld [vmem:[%s2465_s1 + $0x10] sm:$0xff] (!%p150_p6)   ;;  %vm1871_vm1 = vmmov (!%p150_p6), 0  }
   0xc   : > { %1407 = vmatpush3.bf16.msra.mxu1 (!%p150_p6), %v1934_v1  ;;  %1379 = vmatpush3.bf16.msra.mxu0 (!%p150_p6), %v1934_v1  ;;  %v1983_v18 = vld [vmem:[%s2465_s1 + $0x58] sm:$0xff] (!%p150_p6)   ;;  %v1997_v20 = vld [vmem:[%s2465_s1 + $0x60] sm:$0xff] (!%p150_p6)   ;;  %v2011_v22 = vld [vmem:[%s2465_s1 + $0x68] sm:$0xff] (!%p150_p6)   ;;  %s175_s10 = sand.u32 (!%p150_p6), 1, %s1828_s12  }
   0xd   : > { %1408 = vmatprep.subr.bf16.mxu1 (!%p150_p6), %v1941_v2  ;;  %1380 = vmatprep.subr.bf16.mxu0 (!%p150_p6), %v1941_v2  ;;  %v1988_v19 = vld [vmem:[%s2465_s1 + $0x18] sm:$0xff] (!%p150_p6)   ;;  %v2002_v21 = vld [vmem:[%s2465_s1 + $0x20] sm:$0xff] (!%p150_p6)   ;;  %v2016_v23 = vld [vmem:[%s2465_s1 + $0x28] sm:$0xff] (!%p150_p6)  }
   0xe   : > { %v2021_v24 = vld [vmem:[%s2465_s1 + $0x70] sm:$0xff] (!%p150_p6)   ;;  %v2036_v26 = vld [vmem:[%s2465_s1 + $0x78] sm:$0xff] (!%p150_p6)   ;;  %v1729_v49 = vld [vmem:[%s2465_s1 + $0x80] sm:$0xff] (!%p150_p6)  }
   0xf   : > { %v2029_v25 = vld [vmem:[%s2465_s1 + $0x30] sm:$0xff] (!%p150_p6)   ;;  %v2043_v27 = vld [vmem:[%s2465_s1 + $0x38] sm:$0xff] (!%p150_p6)   ;;  %v1730_v56 = vld [vmem:[%s2465_s1 + $0x88] sm:$0xff] (!%p150_p6)  }
  0x10   : > { %1409 = vmatpush3.bf16.msra.mxu1 (!%p150_p6), %v1948_v3  ;;  %1381 = vmatpush3.bf16.msra.mxu0 (!%p150_p6), %v1948_v3  ;;  %v1731_v61 = vld [vmem:[%s2465_s1 + $0x90] sm:$0xff] (!%p150_p6)   ;;  %v1732_v63 = vld [vmem:[%s2465_s1 + $0x98] sm:$0xff] (!%p150_p6)  }
  0x11   : > { %1410 = vmatprep.subr.bf16.mxu1 (!%p150_p6), %v1955_v4  ;;  %1382 = vmatprep.subr.bf16.mxu0 (!%p150_p6), %v1955_v4 }
  0x12   : > { %s185_s26 = scalar_select %p184_p7, %s1923_s21, 2 }
  0x13   : > { %s1148_s12 = ssub.s32 (%p1918_p4), 3, %s1923_s21  ;;  %s1621_s17 = smul.u32 (%p1918_p4), 48, %s1906_s15 }
  0x14   : > { %s1620_s4 = smul.u32 24, %s185_s26  ;;  %1411 = vmatpush3.bf16.msra.mxu1 %v1961_v5  ;;  %1383 = vmatpush3.bf16.msra.mxu0 %v1961_v5  ;;  %p1149_p8 = scmp.lt.s32.totalorder (%p1918_p4), %s1148_s12, 2 }
  0x15   : > { %1412 = vmatprep.subr.bf16.mxu1 %v1983_v18  ;;  %1384 = vmatprep.subr.bf16.mxu0 %v1983_v18  ;;  %s2397_s23 = scalar_lea.vmem (%p1918_p4), %s2467_s3, %s1621_s17  }
  0x16   : > { %s188_s11 = scalar_lea.vmem %s2464_s0, %s1620_s4 }
  0x17   : > { %v202_v6 = vld [vmem:[%s188_s11] sm:$0xff]  ;;  %v203_v7 = vld [vmem:[%s188_s11 + $0x8] sm:$0xff]  ;;  %v1966_v8 = vld [vmem:[%s188_s11 + $0x10] sm:$0xff] }
  0x18   : > { %v209_v9 = vsel %vm208_vm0, %v1966_v8, -inf  ;;  %v205_v10 = vld [vmem:[%s188_s11 + $0x18] sm:$0xff]  ;;  %v206_v11 = vld [vmem:[%s188_s11 + $0x20] sm:$0xff]  ;;  %v1972_v12 = vld [vmem:[%s188_s11 + $0x28] sm:$0xff]  ;;  %1413 = vmatpush3.bf16.msra.mxu1 %v1988_v19  ;;  %1385 = vmatpush3.bf16.msra.mxu0 %v1988_v19  ;;  %s1619_s11 = smul.u32 48, %s175_s10 }
  0x19   : > { %v210_v13 = vmax.f32 %v202_v6, %v209_v9  ;;  %v214_v14 = vsel %vm208_vm0, %v1972_v12, -inf  ;;  %1414 = vmatprep.subr.bf16.mxu1 %v1997_v20  ;;  %1386 = vmatprep.subr.bf16.mxu0 %v1997_v20 }
  0x1a   : > { %v215_v15 = vmax.f32 %v205_v10, %v214_v14  ;;  %s2377_s14 = scalar_lea.vmem [#allocation2], %s1619_s11  }
  0x1b   : > { %v211_v16 = vmax.f32 %v210_v13, %v203_v7 }
  0x1c   : > { %v216_v17 = vmax.f32 %v215_v15, %v206_v11  ;;  %1415 = vmatpush3.bf16.msra.mxu1 %v2002_v21  ;;  %1387 = vmatpush3.bf16.msra.mxu0 %v2002_v21 }
  0x1d   : > { %212 = vmax.xlane.f32.xlu0 %v211_v16  ;;  %1416 = vmatprep.subr.bf16.mxu1 %v2011_v22 }
  0x1e   : > { %1388 = vmatprep.subr.bf16.mxu0 %v2011_v22 }
  0x20   : > { %1417 = vmatpush3.bf16.msra.mxu1 %v2016_v23  ;;  %1389 = vmatpush3.bf16.msra.mxu0 %v2016_v23 }
  0x21   : > { %217 = vmax.xlane.f32.xlu0 %v216_v17  ;;  %1418 = vmatprep.subr.bf16.mxu1 %v2021_v24 }
  0x22   : > { %1390 = vmatprep.subr.bf16.mxu0 %v2021_v24 }
  0x24   : > { %1419 = vmatpush3.bf16.msra.mxu1 %v2029_v25  ;;  %1391 = vmatpush3.bf16.msra.mxu0 %v2029_v25 }
  0x25   : > { %1420 = vmatprep.subr.bf16.mxu1 %v2036_v26  ;;  %1392 = vmatprep.subr.bf16.mxu0 %v2036_v26 }
  0x28   : > { %1421 = vmatpush3.bf16.msra.mxu1 %v2043_v27  ;;  %1393 = vmatpush3.bf16.msra.mxu0 %v2043_v27 }
  0x29   : > { %1503 = vmatprep.subr.bf16.mxu1 %v1870_v28  ;;  %1489 = vmatprep.subr.bf16.mxu0 %v1870_v28 }
  0xaa   : > { %v213_v29 = vpop.xlane.xlu0 %212 }
  0xab   : > { %v219_v30 = vsub.f32 %v202_v6, %v213_v29  ;;  %v220_v31 = vsub.f32 %v203_v7, %v213_v29  ;;  %v221_v41 = vsub.f32 %v1966_v8, %v213_v29  ;;  %v1733_v8 = vld [vmem:[%s2465_s1 + $0xa0] sm:$0xff]  }
  0xad   : > { %v225_v32 = vmul.f32 1.442695, %v219_v30  ;;  %v227_v33 = vmul.f32 1.442695, %v220_v31  ;;  %v229_v47 = vmul.f32 1.442695, %v221_v41 }
  0xae   : > { %v218_v34 = vpop.xlane.xlu0 %217  ;;  %v2250_v41 = vld [vmem:[%s2466_s2 + $0x78] ss:$12 sps:$4 sm:$0xff]  }
  0xaf   : > { %v222_v35 = vsub.f32 %v205_v10, %v218_v34  ;;  %v223_v36 = vsub.f32 %v206_v11, %v218_v34  ;;  %1766 = vpow2.f32 %v225_v32  ;;  %v224_v39 = vsub.f32 %v1972_v12, %v218_v34  ;;  %v2212_v34 = vld [vmem:[%s2466_s2 + $0x48] ss:$12 sps:$4 sm:$0xff]  }
  0xb0   : > { %1768 = vpow2.f32 %v227_v33  ;;  %v2206_v33 = vld [vmem:[%s2466_s2 + $0x4c] ss:$12 sps:$4 sm:$0xff]  }
  0xb1   : > { %v231_v37 = vmul.f32 1.442695, %v222_v35  ;;  %v233_v38 = vmul.f32 1.442695, %v223_v36  ;;  %v235_v44 = vmul.f32 1.442695, %v224_v39 }
  0xb2   : > { %v2217_v35 = vld [vmem:[%s2466_s2 + $0x50] ss:$12 sps:$4 sm:$0xff]  }
  0xb3   : > { %1770 = vpow2.f32 %v231_v37  ;;  %v2225_v36 = vld [vmem:[%s2466_s2 + $0x64] ss:$12 sps:$4 sm:$0xff]   ;;  %v2231_v37 = vld [vmem:[%s2466_s2 + $0x60] ss:$12 sps:$4 sm:$0xff]   ;;  %v2244_v39 = vld [vmem:[%s2466_s2 + $0x7c] ss:$12 sps:$4 sm:$0xff]  }
  0xb4   : > { %1772 = vpow2.f32 %v233_v38  ;;  %v2236_v38 = vld [vmem:[%s2466_s2 + $0x68] ss:$12 sps:$4 sm:$0xff]  }
  0xb5   : > { %1774 = vpow2.f32 %v235_v44  ;;  %v2255_v44 = vld [vmem:[%s2466_s2 + $0x80] ss:$12 sps:$4 sm:$0xff]  }
  0xb6   : > { %1776 = vpow2.f32 %v229_v47  ;;  %v2269_v47 = vld [vmem:[%s2466_s2 + $0x90] ss:$12 sps:$4 sm:$0xff]  }
  0xb9   : > { %v2053_v40 = vpop.eup %1766 }
  0xba   : > { %v2056_v42 = vpop.eup %1768 }
  0xbd   : > { %v2058_v43 = vpop.eup %1770 }
  0xbe   : > { %v2060_v45 = vpop.eup %1772  ;;  %v279_v46 = vpack.c.bf16 %v2058_v43, %v2053_v40 }
  0xbf   : > { %v280_v48 = vpack.c.bf16 %v2060_v45, %v2056_v42  ;;  %v2095_v62 = vpop.eup %1774 }
  0xc0   : > { %v282_v50 = vunpack.c.l.bf16 %v279_v46  ;;  %v285_v51 = vunpack.c.h.bf16 %v279_v46  ;;  %v2101_v6 = vpop.eup %1776 }
  0xc1   : > { %558 = vmatprep.mubr.bf16.mxu1 %v280_v48  ;;  %v283_v52 = vunpack.c.l.bf16 %v280_v48  ;;  %v286_v53 = vunpack.c.h.bf16 %v280_v48  ;;  %v281_v7 = vpack.c.bf16 %v2095_v62, %v2101_v6  ;;  %v2274_v48 = vld [vmem:[%s2466_s2 + $0x98] ss:$12 sps:$4 sm:$0xff]  }
  0xc2   : > { %559 = vmatmul.mubr.bf16.vlgmr.msra.gmra.mrb[0].mxu1 %v279_v46  ;;  %v2070_v54 = vsub.f32 %v2053_v40, %v282_v50  ;;  %v2073_v55 = vsub.f32 %v2058_v43, %v285_v51  ;;  %v2263_v46 = vld [vmem:[%s2466_s2 + $0x94] ss:$12 sps:$4 sm:$0xff]   ;;  %v2287_v50 = vld [vmem:[%s2466_s2 + $0xac] ss:$12 sps:$4 sm:$0xff]   ;;  %v2292_v51 = vld [vmem:[%s2466_s2 + $0xb0] ss:$12 sps:$4 sm:$0xff]  }
  0xc3   : > { %1504 = vmatpush3.bf16.msra.mxu1 %v1729_v49  ;;  %v289_v57 = vsub.f32 %v2056_v42, %v283_v52  ;;  %v292_v58 = vsub.f32 %v2060_v45, %v286_v53  ;;  %1513 = vmatprep.mubr.msk.bf16.mxu1 %vm1871_vm1, %v1870_v28  ;;  %v284_v9 = vunpack.c.l.bf16 %v281_v7  ;;  %v287_v10 = vunpack.c.h.bf16 %v281_v7 }
  0xc4   : > { %1505 = vmatprep.subr.bf16.mxu1 %v1870_v28  ;;  %v2085_v59 = vpack.c.bf16 %v2073_v55, %v2070_v54  ;;  %v1872_v52 = vmov 0  }
  0xc5   : > { %v295_v60 = vpack.c.bf16 %v292_v58, %v289_v57  ;;  %v290_v13 = vsub.f32 %v2101_v6, %v284_v9  ;;  %v293_v14 = vsub.f32 %v2095_v62, %v287_v10 }
  0xc7   : > { %1506 = vmatpush3.bf16.msra.mxu1 %v1730_v56  ;;  %473 = vmatprep.mubr.bf16.mxu0 %v295_v60  ;;  %v298_v11 = vunpack.c.l.bf16 %v295_v60  ;;  %v301_v12 = vunpack.c.h.bf16 %v295_v60  ;;  %v296_v17 = vpack.c.bf16 %v293_v14, %v290_v13 }
  0xc8   : > { %474 = vmatmul.mubr.bf16.vlgmr.msra.gmra.mrb[0].mxu0 %v2085_v59  ;;  %1507 = vmatprep.subr.bf16.mxu1 %v1870_v28 }
  0xc9   : > { %1490 = vmatpush3.bf16.msra.mxu0 %v1729_v49  ;;  %1499 = vmatprep.mubr.msk.bf16.mxu0 %vm1871_vm1, %v1870_v28  ;;  %v304_v15 = vsub.f32 %v289_v57, %v298_v11  ;;  %v307_v16 = vsub.f32 %v292_v58, %v301_v12  ;;  %v299_v30 = vunpack.c.l.bf16 %v296_v17  ;;  %v302_v31 = vunpack.c.h.bf16 %v296_v17 }
  0xca   : > { %1491 = vmatprep.subr.bf16.mxu0 %v1870_v28 }
  0xcb   : > { %1508 = vmatpush3.bf16.msra.mxu1 %v1731_v61  ;;  %v310_v29 = vpack.c.bf16 %v307_v16, %v304_v15  ;;  %v308_v32 = vsub.f32 %v293_v14, %v302_v31 }
  0xcc   : > { %1509 = vmatprep.subr.bf16.mxu1 %v1870_v28 }
  0xcd   : > { %1492 = vmatpush3.bf16.msra.mxu0 %v1730_v56 }
  0xce   : > { %1493 = vmatprep.subr.bf16.mxu0 %v1870_v28 }
  0xcf   : > { %1510 = vmatpush3.bf16.msra.mxu1 %v1732_v63 }
  0xd0   : > { %1511 = vmatprep.subr.bf16.mxu1 %v1870_v28 }
  0xd1   : > { %1494 = vmatpush3.bf16.msra.mxu0 %v1731_v61 }
  0xd2   : > { %1495 = vmatprep.subr.bf16.mxu0 %v1870_v28 }
  0xd3   : > { %1512 = vmatpush3.bf16.msra.mxu1 %v1733_v8 }
  0xd4   : > { %1517 = vmatprep.subr.bf16.mxu1 %v1870_v28 }
  0xd5   : > { %1496 = vmatpush3.bf16.msra.mxu0 %v1732_v63 }
  0xd6   : > { %1514 = vmatmul.mubr.msk.bf16.vlgmr.msra.gmra.mrb[4].mxu1 %vm208_vm0, %v281_v7  ;;  %1497 = vmatprep.subr.bf16.mxu0 %v1870_v28 }
  0xd7   : > { %1518 = vmatpush3.bf16.msra.mxu1 %v1729_v49  ;;  %1527 = vmatprep.mubr.msk.bf16.mxu1 %vm1871_vm1, %v1870_v28  ;;  %v2282_v49 = vld [vmem:[%s2466_s2 + $0xa8] ss:$12 sps:$4 sm:$0xff]  }
  0xd8   : > { %1519 = vmatprep.subr.bf16.mxu1 %v1870_v28 }
  0xd9   : > { %1498 = vmatpush3.bf16.msra.mxu0 %v1733_v8 }
  0xda   : > { %1434 = vmatprep.subr.bf16.mxu0 %v1929_v0  ;;  %v305_v0 = vsub.f32 %v290_v13, %v299_v30 }
  0xdb   : > { %1520 = vmatpush3.bf16.msra.mxu1 %v1730_v56 }
  0xdc   : > { %1500 = vmatmul.mubr.msk.bf16.vlgmr.msra.gmra.mrb[4].mxu0 %vm208_vm0, %v296_v17  ;;  %1521 = vmatprep.subr.bf16.mxu1 %v1870_v28 }
  0xdd   : > { %1435 = vmatpush3.bf16.msra.mxu0 %v1934_v1  ;;  %643 = vmatprep.mubr.bf16.mxu0 %v310_v29  ;;  %v311_v1 = vpack.c.bf16 %v308_v32, %v305_v0 }
  0xde   : > { %1436 = vmatprep.subr.bf16.mxu0 %v1941_v2  ;;  %v297_v2 = vunpack.c.l.bf16 %v2085_v59 }
  0xdf   : > { %1522 = vmatpush3.bf16.msra.mxu1 %v1731_v61 }
  0xe0   : > { %1523 = vmatprep.subr.bf16.mxu1 %v1870_v28 }
  0xe1   : > { %1437 = vmatpush3.bf16.msra.mxu0 %v1948_v3  ;;  %v300_v3 = vunpack.c.h.bf16 %v2085_v59 }
  0xe2   : > { %1438 = vmatprep.subr.bf16.mxu0 %v1955_v4  ;;  %v303_v4 = vsub.f32 %v2070_v54, %v297_v2 }
  0xe3   : > { %1524 = vmatpush3.bf16.msra.mxu1 %v1732_v63 }
  0xe4   : > { %1525 = vmatprep.subr.bf16.mxu1 %v1870_v28 }
  0xe5   : > { %1439 = vmatpush3.bf16.msra.mxu0 %v1961_v5  ;;  %v306_v5 = vsub.f32 %v2073_v55, %v300_v3 }
  0xe6   : > { %1440 = vmatprep.subr.bf16.mxu0 %v1983_v18 }
  0xe7   : > { %1526 = vmatpush3.bf16.msra.mxu1 %v1733_v8  ;;  %v309_v18 = vpack.c.bf16 %v306_v5, %v303_v4 }
  0xe8   : > { %1531 = vmatprep.subr.bf16.mxu1 %v1870_v28 }
  0xe9   : > { %1441 = vmatpush3.bf16.msra.mxu0 %v1988_v19  ;;  %v2150_v19 = vld [vmem:[%s2466_s2] ss:$12 sps:$4 sm:$0xff]  }
  0xea   : > { %1528 = vmatmul.mubr.msk.bf16.vlgmr.msra.gmra.mrb[4].mxu1 %vm208_vm0, %v311_v1  ;;  %1442 = vmatprep.subr.bf16.mxu0 %v1997_v20  ;;  %v2155_v20 = vld [vmem:[%s2466_s2 + $0x4] ss:$12 sps:$4 sm:$0xff]  }
  0xeb   : > { %1547 = vmatprep.mubr.msk.bf16.mxu1 %vm1871_vm1, %v1870_v28 }
  0xed   : > { %1443 = vmatpush3.bf16.msra.mxu0 %v2002_v21  ;;  %v2160_v21 = vld [vmem:[%s2466_s2 + $0x8] ss:$12 sps:$4 sm:$0xff]  }
  0xee   : > { %1444 = vmatprep.subr.bf16.mxu0 %v2011_v22  ;;  %1532 = vmatpush3.bf16.msra.mxu1 %v2160_v21  ;;  %v2169_v22 = vld [vmem:[%s2466_s2 + $0x1c] ss:$12 sps:$4 sm:$0xff]  }
  0xef   : > { %1533 = vmatprep.subr.bf16.mxu1 %v1870_v28 }
  0xf1   : > { %1445 = vmatpush3.bf16.msra.mxu0 %v2016_v23  ;;  %v2174_v23 = vld [vmem:[%s2466_s2 + $0x18] ss:$12 sps:$4 sm:$0xff]  }
  0xf2   : > { %1446 = vmatprep.subr.bf16.mxu0 %v2021_v24  ;;  %v2179_v24 = vld [vmem:[%s2466_s2 + $0x20] ss:$12 sps:$4 sm:$0xff]  }
  0xf3   : > { %1534 = vmatpush3.bf16.msra.mxu1 %v2179_v24 }
  0xf4   : > { %1535 = vmatprep.subr.bf16.mxu1 %v1870_v28 }
  0xf5   : > { %1447 = vmatpush3.bf16.msra.mxu0 %v2029_v25  ;;  %v2187_v25 = vld [vmem:[%s2466_s2 + $0x34] ss:$12 sps:$4 sm:$0xff]  }
  0xf6   : > { %1448 = vmatprep.subr.bf16.mxu0 %v2036_v26  ;;  %v2193_v26 = vld [vmem:[%s2466_s2 + $0x30] ss:$12 sps:$4 sm:$0xff]  }
  0xf9   : > { %1449 = vmatpush3.bf16.msra.mxu0 %v2043_v27  ;;  %v2198_v27 = vld [vmem:[%s2466_s2 + $0x38] ss:$12 sps:$4 sm:$0xff]  }
  0xfa   : > { %870 = vmatprep.subr.bf16.mxu0 %v2155_v20  ;;  %1536 = vmatpush3.bf16.msra.mxu1 %v2198_v27 }
  0xfb   : > { %1537 = vmatprep.subr.bf16.mxu1 %v1870_v28 }
  0xfc   : > { %644 = vmatmul.mubr.bf16.vlgmr.msra.gmra.mrb[8].mxu0 %v309_v18 }
  0xfd   : > { %871 = vmatpush1.bf16.msra.mxu0 %v2150_v19  ;;  %902 = vmatprep.mubr.bf16.mxu0 %v1872_v52 }
  0xfe   : > { %872 = vmatprep.subr.bf16.mxu0 %v2169_v22  ;;  %1538 = vmatpush3.bf16.msra.mxu1 %v2217_v35 }
  0xff   : > { %1539 = vmatprep.subr.bf16.mxu1 %v1870_v28 }
 0x101   : > { %873 = vmatpush1.bf16.msra.mxu0 %v2174_v23 }
 0x102   : > { %874 = vmatprep.subr.bf16.mxu0 %v2187_v25  ;;  %1540 = vmatpush3.bf16.msra.mxu1 %v2236_v38 }
 0x103   : > { %1541 = vmatprep.subr.bf16.mxu1 %v1870_v28 }
 0x105   : > { %875 = vmatpush1.bf16.msra.mxu0 %v2193_v26 }
 0x106   : > { %876 = vmatprep.subr.bf16.mxu0 %v2206_v33  ;;  %1542 = vmatpush3.bf16.msra.mxu1 %v2255_v44 }
 0x107   : > { %1543 = vmatprep.subr.bf16.mxu1 %v1870_v28 }
 0x109   : > { %877 = vmatpush1.bf16.msra.mxu0 %v2212_v34 }
 0x10a   : > { %878 = vmatprep.subr.bf16.mxu0 %v2225_v36  ;;  %1544 = vmatpush3.bf16.msra.mxu1 %v2274_v48 }
 0x10b   : > { %1545 = vmatprep.subr.bf16.mxu1 %v1870_v28 }
 0x10d   : > { %879 = vmatpush1.bf16.msra.mxu0 %v2231_v37 }
 0x10e   : > { %880 = vmatprep.subr.bf16.mxu0 %v2244_v39  ;;  %1546 = vmatpush3.bf16.msra.mxu1 %v2292_v51 }
 0x10f   : > { %1551 = vmatprep.subr.bf16.mxu1 %v1870_v28 }
 0x111   : > { %881 = vmatpush1.bf16.msra.mxu0 %v2250_v41 }
 0x112   : > { %882 = vmatprep.subr.bf16.mxu0 %v2263_v46 }
 0x115   : > { %883 = vmatpush1.bf16.msra.mxu0 %v2269_v47 }
 0x116   : > { %884 = vmatprep.subr.bf16.mxu0 %v2287_v50 }
 0x119   : > { %885 = vmatpush1.bf16.msra.mxu0 %v2282_v49 }
 0x11a   : > { %954 = vmatprep.subr.bf16.mxu0 %v2155_v20 }
 0x195   : > { %v1422_v53 = vpop.f32.mrb[0].mxu1 }
 0x196   : > { %v1423_v54 = vpop.f32.mrb[1].mxu1 }
 0x197   : > { %v1424_v55 = vadd.f32 %v1423_v54, %v1422_v53  ;;  %v1425_v56 = vpop.f32.mrb[2].mxu1 }
 0x198   : > { %v1426_v57 = vpop.f32.mrb[3].mxu1 }
 0x199   : > { %v1427_v58 = vadd.f32 %v1426_v57, %v1425_v56 }
 0x19b   : > { %v1394_v59 = vpop.f32.mrb[0].mxu0 }
 0x19c   : > { %v1395_v60 = vpop.f32.mrb[1].mxu0 }
 0x19d   : > { %v1396_v61 = vadd.f32 %v1395_v60, %v1394_v59  ;;  %v1397_v63 = vpop.f32.mrb[2].mxu0 }
 0x19e   : > { %v1398_v7 = vpop.f32.mrb[3].mxu0 }
 0x19f   : > { %v1399_v8 = vadd.f32 %v1398_v7, %v1397_v63 }
 0x1af   : > { %v516_v9 = vpop.f32.mrb[4].mxu0 }
 0x1b0   : > { %v517_v10 = vadd.f32 %v1396_v61, %v516_v9  ;;  %v1501_v11 = vpop.f32.mrb[5].mxu0 }
 0x1b1   : > { %v519_v12 = vpop.f32.mrb[6].mxu0 }
 0x1b2   : > { %v561_v13 = vadd.f32 %v1424_v55, %v517_v10  ;;  %v520_v14 = vadd.f32 %v1399_v8, %v519_v12  ;;  %v1502_v15 = vpop.f32.mrb[7].mxu0 }
 0x1b4   : > { %v564_v16 = vadd.f32 %v1427_v58, %v520_v14 }
 0x1bd   : > { %v686_v17 = vpop.f32.mrb[4].mxu1 }
 0x1be   : > { %v1529_v29 = vpop.f32.mrb[5].mxu1 }
 0x1bf   : > { %v689_v30 = vpop.f32.mrb[6].mxu1 }
 0x1c0   : > { %v1530_v31 = vpop.f32.mrb[7].mxu1 }
 0x1cf   : > { %v1450_v0 = vpop.f32.mrb[8].mxu0 }
 0x1d0   : > { %v1451_v32 = vpop.f32.mrb[9].mxu0 }
 0x1d1   : > { %v1452_v1 = vadd.f32 %v1451_v32, %v1450_v0  ;;  %v1453_v2 = vpop.f32.mrb[10].mxu0 }
 0x1d2   : > { %v1454_v3 = vpop.f32.mrb[11].mxu0 }
 0x1d3   : > { %v1593_v4 = vadd.f32 %v1452_v1, %v561_v13  ;;  %v1455_v5 = vadd.f32 %v1454_v3, %v1453_v2 }
 0x1d5   : > { %v1594_v18 = vadd.f32 %v1593_v4, %v686_v17  ;;  %v1597_v53 = vadd.f32 %v1455_v5, %v564_v16 }
 0x1d7   : > { %v695_v54 = vmax.f32 %v1594_v18, 1e-30  ;;  %v1598_v56 = vadd.f32 %v1597_v53, %v689_v30 }
 0x1d9   : > { %v696_v57 = vmax.f32 %v1598_v56, 1e-30  ;;  %1778 = vrcp.f32 %v695_v54 }
 0x1db   : > { %1780 = vrcp.f32 %v696_v57 }
 0x1e3   : > { %v1779_v55 = vpop.eup %1778 }
 0x1e5   : > { %v1781_v58 = vpop.eup %1780 }
 0x1e6   : > { %v731_v59 = vpack.c.bf16 %v1781_v58, %v1779_v55 }
 0x1e8   : > { %v732_v60 = vunpack.c.l.bf16 %v731_v59  ;;  %v733_v61 = vunpack.c.h.bf16 %v731_v59 }
 0x1ea   : > { %v734_v63 = vsub.f32 %v1779_v55, %v732_v60  ;;  %v735_v7 = vsub.f32 %v1781_v58, %v733_v61 }
 0x1ec   : > { %v736_v8 = vpack.c.bf16 %v735_v7, %v734_v63 }
 0x1ee   : > { %903 = vmatmul.mubr.bf16.vlgmr.msra.gmra.mrb[12].mxu0 %v736_v8  ;;  %1548 = vmatmul.mubr.bf16.vlgmr.msra.gmra.mrb[8].mxu1 %v736_v8  ;;  %v737_v9 = vunpack.c.l.bf16 %v736_v8  ;;  %v738_v10 = vunpack.c.h.bf16 %v736_v8 }
 0x1ef   : > { %955 = vmatpush1.bf16.msra.mxu0 %v2150_v19  ;;  %1552 = vmatpush3.bf16.msra.mxu1 %v2160_v21 }
 0x1f0   : > { %956 = vmatprep.subr.bf16.mxu0 %v2169_v22  ;;  %1553 = vmatprep.subr.bf16.mxu1 %v1870_v28  ;;  %v739_v11 = vsub.f32 %v734_v63, %v737_v9  ;;  %v740_v12 = vsub.f32 %v735_v7, %v738_v10 }
 0x1f1   : > { %986 = vmatprep.mubr.bf16.mxu0 %v1872_v52  ;;  %1567 = vmatprep.mubr.msk.bf16.mxu1 %vm1871_vm1, %v1870_v28 }
 0x1f2   : > { %v2308_v13 = vpack.c.bf16 %v740_v12, %v739_v11 }
 0x1f3   : > { %957 = vmatpush1.bf16.msra.mxu0 %v2174_v23  ;;  %1554 = vmatpush3.bf16.msra.mxu1 %v2179_v24 }
 0x1f4   : > { %958 = vmatprep.subr.bf16.mxu0 %v2187_v25  ;;  %1555 = vmatprep.subr.bf16.mxu1 %v1870_v28 }
 0x1f7   : > { %959 = vmatpush1.bf16.msra.mxu0 %v2193_v26  ;;  %1556 = vmatpush3.bf16.msra.mxu1 %v2198_v27 }
 0x1f8   : > { %960 = vmatprep.subr.bf16.mxu0 %v2206_v33  ;;  %1557 = vmatprep.subr.bf16.mxu1 %v1870_v28 }
 0x1fb   : > { %961 = vmatpush1.bf16.msra.mxu0 %v2212_v34  ;;  %1558 = vmatpush3.bf16.msra.mxu1 %v2217_v35 }
 0x1fc   : > { %962 = vmatprep.subr.bf16.mxu0 %v2225_v36  ;;  %1559 = vmatprep.subr.bf16.mxu1 %v1870_v28 }
 0x1ff   : > { %963 = vmatpush1.bf16.msra.mxu0 %v2231_v37  ;;  %1560 = vmatpush3.bf16.msra.mxu1 %v2236_v38 }
 0x200   : > { %964 = vmatprep.subr.bf16.mxu0 %v2244_v39  ;;  %1561 = vmatprep.subr.bf16.mxu1 %v1870_v28 }
 0x203   : > { %965 = vmatpush1.bf16.msra.mxu0 %v2250_v41  ;;  %1562 = vmatpush3.bf16.msra.mxu1 %v2255_v44 }
 0x204   : > { %966 = vmatprep.subr.bf16.mxu0 %v2263_v46  ;;  %1563 = vmatprep.subr.bf16.mxu1 %v1870_v28 }
 0x207   : > { %967 = vmatpush1.bf16.msra.mxu0 %v2269_v47  ;;  %1564 = vmatpush3.bf16.msra.mxu1 %v2274_v48 }
 0x208   : > { %968 = vmatprep.subr.bf16.mxu0 %v2287_v50  ;;  %1565 = vmatprep.subr.bf16.mxu1 %v1870_v28 }
 0x20b   : > { %969 = vmatpush1.bf16.msra.mxu0 %v2282_v49  ;;  %1566 = vmatpush3.bf16.msra.mxu1 %v2292_v51 }
 0x20c   : > { %1038 = vmatprep.subr.bf16.mxu0 %v2155_v20  ;;  %1571 = vmatprep.subr.bf16.mxu1 %v1870_v28 }
 0x20e   : > { %987 = vmatmul.mubr.bf16.vlgmr.msra.gmra.mrb[12].mxu0 %v731_v59  ;;  %1568 = vmatmul.mubr.bf16.vlgmr.msra.gmra.mrb[8].mxu1 %v731_v59 }
 0x20f   : > { %1039 = vmatpush1.bf16.msra.mxu0 %v2150_v19  ;;  %1572 = vmatpush3.bf16.msra.mxu1 %v2160_v21 }
 0x210   : > { %1040 = vmatprep.subr.bf16.mxu0 %v2169_v22  ;;  %1573 = vmatprep.subr.bf16.mxu1 %v1870_v28 }
 0x211   : > { %1070 = vmatprep.mubr.bf16.mxu0 %v1872_v52  ;;  %1587 = vmatprep.mubr.msk.bf16.mxu1 %vm1871_vm1, %v1870_v28 }
 0x213   : > { %1041 = vmatpush1.bf16.msra.mxu0 %v2174_v23  ;;  %1574 = vmatpush3.bf16.msra.mxu1 %v2179_v24 }
 0x214   : > { %1042 = vmatprep.subr.bf16.mxu0 %v2187_v25  ;;  %1575 = vmatprep.subr.bf16.mxu1 %v1870_v28 }
 0x217   : > { %1043 = vmatpush1.bf16.msra.mxu0 %v2193_v26  ;;  %1576 = vmatpush3.bf16.msra.mxu1 %v2198_v27 }
 0x218   : > { %1044 = vmatprep.subr.bf16.mxu0 %v2206_v33  ;;  %1577 = vmatprep.subr.bf16.mxu1 %v1870_v28 }
 0x21b   : > { %1045 = vmatpush1.bf16.msra.mxu0 %v2212_v34  ;;  %1578 = vmatpush3.bf16.msra.mxu1 %v2217_v35 }
 0x21c   : > { %1046 = vmatprep.subr.bf16.mxu0 %v2225_v36  ;;  %1579 = vmatprep.subr.bf16.mxu1 %v1870_v28 }
 0x21f   : > { %1047 = vmatpush1.bf16.msra.mxu0 %v2231_v37  ;;  %1580 = vmatpush3.bf16.msra.mxu1 %v2236_v38 }
 0x220   : > { %1048 = vmatprep.subr.bf16.mxu0 %v2244_v39  ;;  %1581 = vmatprep.subr.bf16.mxu1 %v1870_v28 }
 0x223   : > { %1049 = vmatpush1.bf16.msra.mxu0 %v2250_v41  ;;  %1582 = vmatpush3.bf16.msra.mxu1 %v2255_v44 }
 0x224   : > { %1050 = vmatprep.subr.bf16.mxu0 %v2263_v46  ;;  %1583 = vmatprep.subr.bf16.mxu1 %v1870_v28 }
 0x227   : > { %1051 = vmatpush1.bf16.msra.mxu0 %v2269_v47  ;;  %1584 = vmatpush3.bf16.msra.mxu1 %v2274_v48 }
 0x228   : > { %1052 = vmatprep.subr.bf16.mxu0 %v2287_v50  ;;  %1585 = vmatprep.subr.bf16.mxu1 %v1870_v28 }
 0x22b   : > { %1053 = vmatpush1.bf16.msra.mxu0 %v2282_v49  ;;  %1586 = vmatpush3.bf16.msra.mxu1 %v2292_v51 }
 0x22e   : > { %1071 = vmatmul.mubr.bf16.vlgmr.msra.gmra.mrb[12].mxu0 %v2308_v13  ;;  %1588 = vmatmul.mubr.bf16.vlgmr.msra.gmra.mrb[8].mxu1 %v2308_v13 }
 0x301   : > { %v1072_v19 = vpop.f32.mrb[12].mxu0  ;;  %v1115_v20 = vpop.f32.mrb[8].mxu1  ;;  %1146 = sbr.rel (!%p1918_p4) target bundleno = 825 (0x339), region = 36 }
 0x302   : > { %v1128_v21 = vmul.f32 %v2053_v40, %v1072_v19  ;;  %v1130_v22 = vmul.f32 %v2101_v6, %v1115_v20  ;;  %v1074_v23 = vpop.f32.mrb[13].mxu0  ;;  %v1589_v24 = vpop.f32.mrb[9].mxu1 }
 0x303   : > { %v1129_v28 = vmul.f32 %v2056_v42, %v1074_v23  ;;  %v1076_v25 = vpop.f32.mrb[14].mxu0  ;;  %v1118_v26 = vpop.f32.mrb[10].mxu1 }
 0x304   : > { %1134 = vst [vmem:[%s2377_s14] sm:$0xff] %v1128_v21  ;;  %1136 = vst.msk [vmem:[%s2377_s14 + $0x10] sm:$0xff] %vm208_vm0, %v1130_v22  ;;  %v1131_v40 = vmul.f32 %v2058_v43, %v1076_v25  ;;  %v1133_v6 = vmul.f32 %v2095_v62, %v1118_v26  ;;  %v1078_v27 = vpop.f32.mrb[15].mxu0  ;;  %v1590_v33 = vpop.f32.mrb[11].mxu1 }
 0x305   : > { %1135 = vst [vmem:[%s2377_s14 + $0x8] sm:$0xff] %v1129_v28  ;;  %v1132_v42 = vmul.f32 %v2060_v45, %v1078_v27 }
 0x306   : > { %1137 = vst [vmem:[%s2377_s14 + $0x18] sm:$0xff] %v1131_v40  ;;  %1139 = vst.msk [vmem:[%s2377_s14 + $0x28] sm:$0xff] %vm208_vm0, %v1133_v6 }
 0x307   : > { %1138 = vst [vmem:[%s2377_s14 + $0x20] sm:$0xff] %v1132_v42 }
 0x308   : > { %s2477_s12 = smov (!%p1149_p8, %s1148_s12), 2 }
 0x309   : > { %s1366_s24 = smul.u32 384, %s2477_s12 }
 0x30b   : > { %p1370_p9 = scmp.eq.s32.totalorder %s1366_s24, 0 }
 0x30c   : > { %s2403_s25 = sshrl.u32 (!%p1370_p9), %s2477_s12, 1 }
 0x30d   : > { %1159 = sbr.rel (%p1370_p9) target bundleno = 825 (0x339), region = 40  ;;  %p1371_p10 = scmp.le.s32.totalorder (!%p1370_p9), %s2403_s25, 0 }
 0x314   : > { %1266 = sbr.rel (%p1371_p10) target bundleno = 805 (0x325), region = 88  ;;  %s2469_s15 = smov (!%p1371_p10), %s2397_s23 }
 0x315   : > { %s2470_s20 = smov (!%p1371_p10), %s2377_s14  ;;  %s2412_s21 = smov (!%p1371_p10), 0  }
 0x316   : > { %s2414_s26 = smov (!%p1371_p10), 0  }
 0x31b LB: >> { %v1172_v43 = vld [vmem:[%s1844_s20] sm:$0xff]  ;;  %v1174_v45 = vld [vmem:[%s1844_s20 + $0x18] sm:$0xff]  ;;  %v1176_v62 = vld [vmem:[%s1844_s20 + $0x8] sm:$0xff]  ;;  %s1184_s27 = sadd.s32 1, %s1848_s21  ;;  %s1166_s26 = sadd.s32 1, %s1852_s26   ;;  %s1852_s26 = sphi %s2414_s26, %s1166_s26   ;;  %s1848_s21 = sphi %s2412_s21, %s2471_s21   ;;  %s1844_s20 = sphi %s2470_s20, %s1189_s20   ;;  %s1840_s15 = sphi %s2469_s15, %s1190_s15  }
 0x31c   : >> { %1173 = vst [vmem:[%s1840_s15] sm:$0xff] %v1172_v43  ;;  %1175 = vst [vmem:[%s1840_s15 + $0x18] sm:$0xff] %v1174_v45  ;;  %v1178_v34 = vld [vmem:[%s1844_s20 + $0x20] sm:$0xff]  ;;  %v1180_v35 = vld [vmem:[%s1844_s20 + $0x10] sm:$0xff]  ;;  %p1185_p11 = scmp.ge.s32.totalorder %s1184_s27, %s2403_s25  ;;  %p1165_p12 = scmp.ge.s32.totalorder %s1166_s26, %s2403_s25 }
 0x31d   : >> { %1177 = vst [vmem:[%s1840_s15 + $0x8] sm:$0xff] %v1176_v62  ;;  %v1182_v36 = vld [vmem:[%s1844_s20 + $0x28] sm:$0xff]  ;;  %1179 = vst [vmem:[%s1840_s15 + $0x20] sm:$0xff] %v1178_v34 }
 0x31e   : >> { %1181 = vst [vmem:[%s1840_s15 + $0x10] sm:$0xff] %v1180_v35  ;;  %1183 = vst [vmem:[%s1840_s15 + $0x28] sm:$0xff] %v1182_v36  ;;  %s2479_s27 = smov (%p1185_p11, %s1184_s27), 0  ;;  %1168 = sbr.rel (!%p1165_p12) target bundleno = 795 (0x31b), region = 94 }
 0x31f   : >> { %s1187_s28 = smul.u32 48, %s2479_s27  ;;  %s2471_s21 = smov %s2479_s27 }
 0x321   : >> { %s1189_s20 = scalar_lea.vmem %s2377_s14, %s1187_s28 [#allocation2]   ;;  %s1190_s15 = scalar_lea.vmem %s2397_s23, %s1187_s28  }
 0x325 PF: > { %s2433_s29 = sand.u32 1, %s2477_s12   ;;  %s1373_s30 = smul.u32 48, %s2403_s25 }
 0x326   : > { %p1375_p13 = scmp.le.s32.totalorder %s2433_s29, 0 }
 0x327   : > { %s2437_s4 = scalar_lea.vmem %s2377_s14, %s1373_s30 [#allocation2]   ;;  %s2440_s5 = scalar_lea.vmem %s2397_s23, %s1373_s30  }
 0x328   : > { %1280 = sbr.rel (%p1375_p13) target bundleno = 825 (0x339), region = 99  ;;  %s2472_s6 = smov (!%p1375_p13), %s2440_s5 }
 0x329   : > { %s1858_s7 = smov (!%p1375_p13), %s2437_s4   ;;  %s1862_s8 = smov (!%p1375_p13), 0  }
 0x32a   : > { %s1866_s9 = smov (!%p1375_p13), 0  }
 0x32f LB: >> { %v1207_v37 = vld [vmem:[%s1860_s7] sm:$0xff]  ;;  %v1209_v38 = vld [vmem:[%s1860_s7 + $0x8] sm:$0xff]  ;;  %v1211_v39 = vld [vmem:[%s1860_s7 + $0x10] sm:$0xff]  ;;  %s1213_s10 = sadd.s32 1, %s1864_s8  ;;  %s1201_s9 = sadd.s32 1, %s1868_s9   ;;  %s1868_s9 = sphi %s1866_s9, %s1201_s9   ;;  %s1864_s8 = sphi %s1862_s8, %s1863_s8   ;;  %s1860_s7 = sphi %s1858_s7, %s1218_s7   ;;  %s1856_s6 = sphi %s2472_s6, %s1219_s6  }
 0x330   : >> { %1208 = vst [vmem:[%s1856_s6] sm:$0xff] %v1207_v37  ;;  %1210 = vst [vmem:[%s1856_s6 + $0x8] sm:$0xff] %v1209_v38  ;;  %p1214_p0 = scmp.ge.s32.totalorder %s1213_s10, %s2433_s29  ;;  %p1200_p1 = scmp.ge.s32.totalorder %s1201_s9, %s2433_s29 }
 0x331   : >> { %1212 = vst [vmem:[%s1856_s6 + $0x10] sm:$0xff] %v1211_v39 }
 0x332   : >> { %s2481_s10 = smov (%p1214_p0, %s1213_s10), 0  ;;  %1203 = sbr.rel (!%p1200_p1) target bundleno = 815 (0x32f), region = 105 }
 0x333   : >> { %s1216_s11 = smul.u32 24, %s2481_s10  ;;  %s1863_s8 = smov %s2481_s10  }
 0x335   : >> { %s1218_s7 = scalar_lea.vmem %s2437_s4, %s1216_s11 [#allocation2]   ;;  %s1219_s6 = scalar_lea.vmem %s2440_s5, %s1216_s11  }
 0x339 PF: > { %p10_p2 = scmp.ge.s32.totalorder %s1908_s16, 4   ;;  %s2473_s12 = smov %s1832_s13 }
 0x33a   : > { %s2474_s13 = smov %s1916_s19  ;;  %s2475_s14 = smov %s1908_s16 }
 0x33b   :  { %12 = sbr.rel (!%p10_p2) target bundleno = 2 (0x2), region = 116 }

</bundles_post_ra>
